<compile_context>
chip_gen: v5e
topology: v5e:2x2
jax: 0.10.0
libtpu: 0.0.40
codegen_flags: <defaults>
</compile_context>

<pallas_src>
import jax
import jax.numpy as jnp
from jax.experimental import pallas as pl
from jax.experimental.pallas import tpu as pltpu

LANE = 128


def _round_up(n, m):
    return -(-n // m) * m


def mlp_kernel(x_ref, w1_ref, b1_ref, w2_ref, b2_ref, o_ref):
    # Feature-major fused forward for one batch tile:
    #   h = relu(W1 @ X + b1)   -> (16, tb)
    #   y = W2 @ h + b2         -> (12, tb)
    # Weights/biases are f32; activations may be bf16 in HBM (upcast here).
    x = x_ref[...].astype(jnp.float32)                      # (10, tb)
    h = jnp.dot(w1_ref[...], x, preferred_element_type=jnp.float32)
    h = jnp.maximum(h + b1_ref[...], 0.0)                   # (16, tb)
    y = jnp.dot(w2_ref[...], h, preferred_element_type=jnp.float32)
    y = y + b2_ref[...]                                      # (12, tb)
    o_ref[...] = y.astype(o_ref.dtype)


def mlp_forward_fm(x_fm, w1, b1, w2, b2, *, block_batch=32768, out_dtype=None):
    """Fused MLP forward, feature-major.

    x_fm: [10, B] (f32 or bf16), w1: [16, 10], b1: [16, 1],
    w2: [12, 16], b2: [12, 1] (all f32)  ->  out_fm: [12, B] in x_fm's dtype
    (or `out_dtype`).
    """
    f_in, B = x_fm.shape
    hid, _ = w1.shape
    f_out = w2.shape[0]
    out_dtype = out_dtype if out_dtype is not None else x_fm.dtype

    x_isz = jnp.dtype(x_fm.dtype).itemsize
    o_isz = jnp.dtype(out_dtype).itemsize

    # Per-column VMEM footprint (sublane-padded, double-buffered x/out, plus
    # f32 temporaries for the hidden activation).  Cap the tile so it fits a
    # v7x-safe ~40 MiB working set.
    bytes_per_col = (2 * _round_up(f_in, 8) * x_isz
                     + 2 * _round_up(f_out, 8) * o_isz
                     + 2 * _round_up(hid, 8) * 4)
    vmem_cap = 40 << 20
    tb_cap = max(LANE, (vmem_cap // bytes_per_col) // LANE * LANE)

    if B <= 2 * LANE:
        # Too small to split across tiles; single block covering the full
        # batch (block dim == full array dim satisfies the lane rule).
        tb = B
    else:
        # Lane-aligned tile; cap at ceil(B/2) so the grid has >= 2 steps and
        # the "parallel" axis can feed both TensorCores on v7x.
        tb = min(block_batch, tb_cap, _round_up(pl.cdiv(B, 2), LANE))
        tb = max(LANE, tb // LANE * LANE)

    grid = (pl.cdiv(B, tb),)

    out = pl.pallas_call(
        mlp_kernel,
        out_shape=jax.ShapeDtypeStruct((f_out, B), out_dtype),
        grid_spec=pl.GridSpec(
            grid=grid,
            in_specs=[
                # Streaming batch tile of x (batch on lanes -> dense DMA).
                pl.BlockSpec((f_in, tb), lambda i: (0, i)),
                # Weights / biases: constant block index -> loaded once,
                # resident in VMEM for the whole grid.
                pl.BlockSpec(w1.shape, lambda i: (0, 0)),
                pl.BlockSpec(b1.shape, lambda i: (0, 0)),
                pl.BlockSpec(w2.shape, lambda i: (0, 0)),
                pl.BlockSpec(b2.shape, lambda i: (0, 0)),
            ],
            out_specs=pl.BlockSpec((f_out, tb), lambda i: (0, i)),
        ),
        compiler_params=pltpu.CompilerParams(
            dimension_semantics=("parallel",),
            vmem_limit_bytes=48 << 20,
        ),
    )(x_fm, w1, b1, w2, b2)
    return out


def mlp_forward(x, w1, b1, w2, b2, **kwargs):
    """Batch-major convenience wrapper matching the torch module interface.

    x: [B, 10] -> [B, 12].  Pays one transpose pass on x and out; prefer
    mlp_forward_fm with feature-major activations in a real pipeline.
    """
    out_fm = mlp_forward_fm(jnp.transpose(x), w1, b1, w2, b2, **kwargs)
    return jnp.transpose(out_fm)


def init_params(key):
    # Deterministic synthetic init matching torch.nn.Linear shapes:
    #   net1.weight: [16, 10], net1.bias: [16]
    #   net2.weight: [12, 16], net2.bias: [12]
    # Biases stored as columns for the feature-major kernel.
    k1, k2, k3, k4 = jax.random.split(key, 4)
    bound1 = 1.0 / jnp.sqrt(10.0)
    bound2 = 1.0 / jnp.sqrt(16.0)
    w1 = jax.random.uniform(k1, (16, 10), jnp.float32, -bound1, bound1)
    b1 = jax.random.uniform(k2, (16, 1), jnp.float32, -bound1, bound1)
    w2 = jax.random.uniform(k3, (12, 16), jnp.float32, -bound2, bound2)
    b2 = jax.random.uniform(k4, (12, 1), jnp.float32, -bound2, bound2)
    return w1, b1, w2, b2


if __name__ == "__main__":
    key = jax.random.PRNGKey(0)
    k_in, k_params = jax.random.split(key)
    w1, b1, w2, b2 = init_params(k_params)

    def ref_fn(xx):  # batch-major pure-JAX reference (nn.Linear semantics)
        h = jnp.maximum(xx @ w1.T + b1[:, 0], 0.0)
        return h @ w2.T + b2[:, 0]

    # 1) Small, module-consistent shape: batch=8 rows of 10 features (f32).
    batch = 8
    x = jax.random.normal(k_in, (batch, 10), dtype=jnp.float32)
    out = jax.block_until_ready(mlp_forward(x, w1, b1, w2, b2))
    assert out.shape == (batch, 12)
    assert jnp.allclose(out, ref_fn(x), atol=1e-5, rtol=1e-5)

    # 2) Multi-tile + ragged batch (partial last block, no pad/slice passes),
    #    feature-major path with a deliberately small tile.
    batch2 = 300
    x2 = jax.random.normal(k_in, (batch2, 10), dtype=jnp.float32)
    out2_fm = jax.block_until_ready(
        mlp_forward_fm(jnp.transpose(x2), w1, b1, w2, b2, block_batch=128))
    assert out2_fm.shape == (12, batch2)
    assert jnp.allclose(jnp.transpose(out2_fm), ref_fn(x2),
                        atol=1e-5, rtol=1e-5)

    # 3) bf16 activations (halved HBM bytes; weights + accumulation stay f32).
    x_bf = x.astype(jnp.bfloat16)
    out_bf = jax.block_until_ready(mlp_forward(x_bf, w1, b1, w2, b2))
    assert out_bf.dtype == jnp.bfloat16
    assert jnp.allclose(out_bf.astype(jnp.float32),
                        ref_fn(x_bf.astype(jnp.float32)),
                        atol=2e-2, rtol=2e-2)

    print("KERNEL_OK")
</pallas_src>

<mosaic_0001>
module attributes {stable_mosaic.version = 11 : i64} {
  func.func @mlp_kernel(%arg0: i32, %arg1: memref<10x8xf32, #tpu.memory_space<vmem>>, %arg2: memref<16x10xf32, #tpu.memory_space<vmem>>, %arg3: memref<16x1xf32, #tpu.memory_space<vmem>>, %arg4: memref<12x16xf32, #tpu.memory_space<vmem>>, %arg5: memref<12x1xf32, #tpu.memory_space<vmem>>, %arg6: memref<12x8xf32, #tpu.memory_space<vmem>>) attributes {dimension_semantics = [#tpu.dimension_semantics<parallel>], iteration_bounds = array<i64: 1>, scalar_prefetch = 0 : i64, scratch_operands = 0 : i64, tpu.core_type = #tpu.core_type<tc>, window_params = [{transform_indices = @transform_0, window_bounds = array<i64: 10, 8>}, {pipeline_mode = #tpu.pipeline_mode<synchronous>, transform_indices = @transform_1, window_bounds = array<i64: 16, 10>}, {pipeline_mode = #tpu.pipeline_mode<synchronous>, transform_indices = @transform_2, window_bounds = array<i64: 16, 1>}, {pipeline_mode = #tpu.pipeline_mode<synchronous>, transform_indices = @transform_3, window_bounds = array<i64: 12, 16>}, {pipeline_mode = #tpu.pipeline_mode<synchronous>, transform_indices = @transform_4, window_bounds = array<i64: 12, 1>}, {transform_indices = @transform_5, window_bounds = array<i64: 12, 8>}]} {
    %c0 = arith.constant 0 : index
    %c0_0 = arith.constant 0 : index
    %0 = vector.load %arg1[%c0, %c0_0] : memref<10x8xf32, #tpu.memory_space<vmem>>, vector<10x8xf32>
    %c0_1 = arith.constant 0 : index
    %c0_2 = arith.constant 0 : index
    %1 = vector.load %arg2[%c0_1, %c0_2] : memref<16x10xf32, #tpu.memory_space<vmem>>, vector<16x10xf32>
    %cst = arith.constant dense<0.000000e+00> : vector<16x8xf32>
    %2 = tpu.matmul %1, %0, %cst {dimension_numbers = #tpu.dot_dimension_numbers<[1], [0], [0], [1], [0, 0, 1, 1], [], []>} : vector<16x10xf32>, vector<10x8xf32>, vector<16x8xf32> -> vector<16x8xf32>
    %c0_3 = arith.constant 0 : index
    %c0_4 = arith.constant 0 : index
    %3 = vector.load %arg3[%c0_3, %c0_4] : memref<16x1xf32, #tpu.memory_space<vmem>>, vector<16x1xf32>
    %4 = vector.broadcast %3 : vector<16x1xf32> to vector<16x8xf32>
    %5 = arith.addf %2, %4 : vector<16x8xf32>
    %cst_5 = arith.constant 0.000000e+00 : f32
    %6 = vector.broadcast %cst_5 : f32 to vector<16x8xf32>
    %7 = arith.maximumf %5, %6 : vector<16x8xf32>
    %c0_6 = arith.constant 0 : index
    %c0_7 = arith.constant 0 : index
    %8 = vector.load %arg4[%c0_6, %c0_7] : memref<12x16xf32, #tpu.memory_space<vmem>>, vector<12x16xf32>
    %cst_8 = arith.constant dense<0.000000e+00> : vector<12x8xf32>
    %9 = tpu.matmul %8, %7, %cst_8 {dimension_numbers = #tpu.dot_dimension_numbers<[1], [0], [0], [1], [0, 0, 1, 1], [], []>} : vector<12x16xf32>, vector<16x8xf32>, vector<12x8xf32> -> vector<12x8xf32>
    %c0_9 = arith.constant 0 : index
    %c0_10 = arith.constant 0 : index
    %10 = vector.load %arg5[%c0_9, %c0_10] : memref<12x1xf32, #tpu.memory_space<vmem>>, vector<12x1xf32>
    %11 = vector.broadcast %10 : vector<12x1xf32> to vector<12x8xf32>
    %12 = arith.addf %9, %11 : vector<12x8xf32>
    %c0_11 = arith.constant 0 : index
    %c0_12 = arith.constant 0 : index
    %13 = vector.load %arg6[%c0_11, %c0_12] : memref<12x8xf32, #tpu.memory_space<vmem>>, vector<12x8xf32>
    tpu.vector_store %arg6[%c0_11, %c0_12], %12 {strides = array<i32>} : memref<12x8xf32, #tpu.memory_space<vmem>>, vector<12x8xf32>,
    return
  }
  func.func @transform_0(%arg0: i32) -> (i32, i32) {
    %c0_i32 = arith.constant 0 : i32
    %c0_i32_0 = arith.constant 0 : i32
    return %c0_i32, %arg0 : i32, i32
  }
  func.func @transform_1(%arg0: i32) -> (i32, i32) {
    %c0_i32 = arith.constant 0 : i32
    %c0_i32_0 = arith.constant 0 : i32
    %c0_i32_1 = arith.constant 0 : i32
    return %c0_i32, %c0_i32_0 : i32, i32
  }
  func.func @transform_2(%arg0: i32) -> (i32, i32) {
    %c0_i32 = arith.constant 0 : i32
    %c0_i32_0 = arith.constant 0 : i32
    %c0_i32_1 = arith.constant 0 : i32
    return %c0_i32, %c0_i32_0 : i32, i32
  }
  func.func @transform_3(%arg0: i32) -> (i32, i32) {
    %c0_i32 = arith.constant 0 : i32
    %c0_i32_0 = arith.constant 0 : i32
    %c0_i32_1 = arith.constant 0 : i32
    return %c0_i32, %c0_i32_0 : i32, i32
  }
  func.func @transform_4(%arg0: i32) -> (i32, i32) {
    %c0_i32 = arith.constant 0 : i32
    %c0_i32_0 = arith.constant 0 : i32
    %c0_i32_1 = arith.constant 0 : i32
    return %c0_i32, %c0_i32_0 : i32, i32
  }
  func.func @transform_5(%arg0: i32) -> (i32, i32) {
    %c0_i32 = arith.constant 0 : i32
    %c0_i32_0 = arith.constant 0 : i32
    return %c0_i32, %arg0 : i32, i32
  }
}

</mosaic_0001>

<bundles_post_ra>
// kernel: tpu_custom_call.1
= control target key start
LH: loop header
LB: loop body
LE: loop exit
PB: predicated region body
PF: predicated region fallthrough
CT: control target
= control target key end

     0   :  { %vm43_vm0 = vcmask 1041408   ;;  %v136_v2 = vmov 0   ;;  %vm36_vm1 = vcmask 80896   ;;  %vm86_vm2 = vcmask 130048   ;;  %s203_s0 = inlined_call_operand.vmem [shape: f32[10,8], index: 0, kind: input, shape index: {}]   ;;  %s204_s1 = inlined_call_operand.vmem [shape: f32[16,10], index: 1, kind: input, shape index: {}]   ;;  %s205_s2 = inlined_call_operand.vmem [shape: f32[16,1], index: 2, kind: input, shape index: {}]   ;;  %s206_s4 = inlined_call_operand.vmem [shape: f32[12,1], index: 4, kind: input, shape index: {}]   ;;  %s207_s3 = inlined_call_operand.vmem [shape: f32[12,16], index: 3, kind: input, shape index: {}]   ;;  %s208_s5 = inlined_call_operand.vmem [shape: f32[12,8], index: 5, kind: output, shape index: {}]  }
   0x1   :  { %v21_v0 = vld [vmem:[%s203_s0 + $0x8] sm:$0x3]  ;;  %v20_v1 = vld [vmem:[%s203_s0] sm:$0xff]  ;;  %134 = vset.pattern.permute.xlu0 %v136_v2  ;;  %135 = vset.pattern.permute.xlu1 %v136_v2  ;;  %vm116_vm3 = vcmask 64512   ;;  %vm118_vm4 = vcmask 60416  }
   0x2   :  { %124 = vmatpush.msk.msra.mxu0 %vm43_vm0, %v21_v0  ;;  %129 = vmatpush.msk.msra.mxu2 %vm43_vm0, %v21_v0  ;;  %v22_v3 = vld [vmem:[%s204_s1] sm:$0xff]  ;;  %v23_v4 = vld [vmem:[%s204_s1 + $0x8] sm:$0xff] }
   0x3   :  { %v25_v5 = vld [vmem:[%s205_s2 + $0x8] sm:$0xff]  ;;  %v24_v6 = vld [vmem:[%s205_s2] sm:$0xff] }
   0x4   :  { %33 = vperm.xlu0 %134, %v25_v5   ;;  %62 = vmatpush.msra.mxu0 %v20_v1  ;;  %v74_v7 = vld [vmem:[%s206_s4] sm:$0xff]  ;;  %v75_v8 = vld [vmem:[%s206_s4 + $0x8] sm:$0xf] }
   0x5   :  { %130 = vmatpush.msra.mxu2 %v20_v1  ;;  %125 = vmatmul.msk.f32.vlgmr.msra.gmra.mxu0 %vm36_vm1, %v22_v3  ;;  %v72_v17 = vld [vmem:[%s207_s3] sm:$0xff]  ;;  %v73_v18 = vld [vmem:[%s207_s3 + $0x8] sm:$0xf] }
   0x6   :  { %126 = vmatmul.msk.f32.vlgmr.msra.gmra.mxu2 %vm36_vm1, %v23_v4  ;;  %78 = vperm.xlu1 %135, %v74_v7  }
   0xc   :  { %28 = vperm.xlu0 %134, %v24_v6  }
   0xe   :  { %83 = vperm.xlu1 %135, %v75_v8  }
  0x76   :  { %v34_v9 = vpop.permute.xlu0 %33 }
  0x78   :  { %v79_v19 = vpop.permute.xlu1 %78 }
  0x7e   :  { %v29_v10 = vpop.permute.xlu0 %28 }
  0x80   :  { %v84_v22 = vpop.permute.xlu1 %83 }
  0x82   :  { %v64_v11 = vpop.f32.mrf.mxu0 }
  0x83   :  { %v65_v13 = vadd.f32 %v64_v11, %v29_v10 }
  0x85   :  { %v70_v16 = vmax.f32 %v65_v13, 0.0 }
  0x89   :  { %v67_v12 = vpop.f32.mrf.mxu2 }
  0x8a   :  { %v68_v14 = vadd.f32 %v67_v12, %v34_v9 }
  0x8c   :  { %v71_v15 = vmax.f32 %v68_v14, 0.0 }
  0x8e   :  { %107 = vmatpush.msra.mxu1 %v71_v15  ;;  %131 = vmatpush.msra.mxu3 %v71_v15 }
  0x90   :  { %108 = vmatpush.msra.mxu1 %v70_v16  ;;  %132 = vmatpush.msra.mxu3 %v70_v16 }
  0x91   :  { %127 = vmatmul.msk.f32.vlgmr.msra.gmra.mxu1 %vm86_vm2, %v72_v17  ;;  %128 = vmatmul.msk.f32.vlgmr.msra.gmra.mxu3 %vm86_vm2, %v73_v18 }
 0x10e   :  { %v110_v20 = vpop.f32.mrf.mxu1 }
 0x10f   :  { %v111_v21 = vadd.f32 %v110_v20, %v79_v19 }
 0x111   :  { %117 = vst.msk [vmem:[%s208_s5] sm:$0xff] %vm116_vm3, %v111_v21 }
 0x114   :  { %v113_v23 = vpop.f32.mrf.mxu3 }
 0x115   :  { %v114_v24 = vadd.f32 %v113_v23, %v84_v22 }
 0x117   :  { %119 = vst.msk [vmem:[%s208_s5 + $0x8] sm:$0xf] %vm118_vm4, %v114_v24 }

</bundles_post_ra>
